<compile_context>
chip_gen: v6e
topology: v6e:2x2x1
jax: 0.10.0
libtpu: 0.0.40
codegen_flags: <defaults>
</compile_context>

<pallas_src>
import functools

import jax
import jax.numpy as jnp
from jax.experimental import pallas as pl
from jax.experimental.pallas import tpu as pltpu

_LANE = 128
_SUBLANE = 8


def _mlp_kernel(x_ref, w1_ref, b1_ref, w2_ref, b2_ref, o_ref):
    # x: (TN, d_in) f32   w1: (d_in, Hp) bf16   b1: (1, Hp) f32
    # w2: (Hp, Dp) bf16   b2: (1, Dp) f32       o: (TN, Dp) f32
    x = x_ref[...]
    # MXU: bf16 operands, f32 accumulation.
    h = jnp.dot(x.astype(jnp.bfloat16), w1_ref[...],
                preferred_element_type=jnp.float32)
    # VPU work stays in f32 (bias add + ReLU); single broadcast per tile.
    h = jnp.maximum(h + b1_ref[...], 0.0)
    o = jnp.dot(h.astype(jnp.bfloat16), w2_ref[...],
                preferred_element_type=jnp.float32)
    o_ref[...] = (o + b2_ref[...]).astype(o_ref.dtype)


def _round_up(v, m):
    return pl.cdiv(v, m) * m


@functools.partial(jax.jit, static_argnames=("row_tile",))
def my_edge_conv_forward(x, w1, b1, w2, b2, *, row_tile=512):
    """x: (N, D_in); w1: (D_in, H); b1: (1, H); w2: (H, D_out); b2: (1, D_out).

    Weights are stored pre-transposed relative to nn.Linear's (out, in) layout
    so the kernel computes plain x @ W (+ b) on the MXU without transposes.
    """
    N, d_in = x.shape
    H = w1.shape[1]
    d_out = w2.shape[1]

    # Lane-dense hidden / output widths (>=128, multiple of 128).
    H_pad = _round_up(max(H, _LANE), _LANE)
    dout_pad = _round_up(max(d_out, _LANE), _LANE)

    # Row tile: multiple of the f32 sublane (8); pad N up to a tile multiple.
    TN = min(_round_up(row_tile, _SUBLANE), _round_up(N, _SUBLANE))
    N_pad = _round_up(N, TN)

    x_p = x if N_pad == N else jnp.pad(x, ((0, N_pad - N), (0, 0)))

    # Zero-pad parameters once (tiny); bf16 weights for the MXU, f32 biases.
    w1_p = jnp.pad(w1, ((0, 0), (0, H_pad - H))).astype(jnp.bfloat16)
    b1_p = jnp.pad(b1, ((0, 0), (0, H_pad - H))).astype(jnp.float32)
    w2_p = jnp.pad(w2, ((0, H_pad - H), (0, dout_pad - d_out))).astype(jnp.bfloat16)
    b2_p = jnp.pad(b2, ((0, 0), (0, dout_pad - d_out))).astype(jnp.float32)

    grid = (N_pad // TN,)

    out_padded = pl.pallas_call(
        _mlp_kernel,
        out_shape=jax.ShapeDtypeStruct((N_pad, dout_pad), jnp.float32),
        grid_spec=pltpu.PrefetchScalarGridSpec(
            num_scalar_prefetch=0,
            grid=grid,
            in_specs=[
                # Row tile of activations moves with the grid.
                pl.BlockSpec((TN, d_in), lambda i: (i, 0)),
                # Parameters stay resident (same block every step).
                pl.BlockSpec((d_in, H_pad), lambda i: (0, 0)),
                pl.BlockSpec((1, H_pad), lambda i: (0, 0)),
                pl.BlockSpec((H_pad, dout_pad), lambda i: (0, 0)),
                pl.BlockSpec((1, dout_pad), lambda i: (0, 0)),
            ],
            out_specs=pl.BlockSpec((TN, dout_pad), lambda i: (i, 0)),
        ),
        compiler_params=pltpu.CompilerParams(
            dimension_semantics=("parallel",),      # row tiles split across TCs
            vmem_limit_bytes=32 * 1024 * 1024,      # safe for v7x's 64 MiB VMEM
        ),
    )(x_p, w1_p, b1_p, w2_p, b2_p)

    return out_padded[:N, :d_out]


def reference_forward(x, w1, b1, w2, b2):
    h = jnp.maximum(x @ w1 + b1, 0.0)
    return h @ w2 + b2


def _make_params(key, input_dims, hidden_dims, output_dims):
    kw1, kb1, kw2, kb2 = jax.random.split(key, 4)
    s1 = 1.0 / jnp.sqrt(input_dims)
    w1 = jax.random.uniform(kw1, (input_dims, hidden_dims), jnp.float32, -s1, s1)
    b1 = jax.random.uniform(kb1, (1, hidden_dims), jnp.float32, -s1, s1)
    s2 = 1.0 / jnp.sqrt(hidden_dims)
    w2 = jax.random.uniform(kw2, (hidden_dims, output_dims), jnp.float32, -s2, s2)
    b2 = jax.random.uniform(kb2, (1, output_dims), jnp.float32, -s2, s2)
    return w1, b1, w2, b2


if __name__ == "__main__":
    input_dims, hidden_dims, output_dims = 32, 64, 16

    key = jax.random.PRNGKey(0)
    kx1, kx2, kp = jax.random.split(key, 3)
    w1, b1, w2, b2 = _make_params(kp, input_dims, hidden_dims, output_dims)

    # bf16 matmul operands (f32 accumulation) -> loose tolerance vs f32 ref.
    TOL = dict(atol=5e-2, rtol=5e-2)

    # Case 1: tiny batch (shapes implied by the module), single grid step.
    x_small = jax.random.normal(kx1, (8, input_dims), dtype=jnp.float32)
    out_small = jax.block_until_ready(
        my_edge_conv_forward(x_small, w1, b1, w2, b2))
    ref_small = reference_forward(x_small, w1, b1, w2, b2)
    assert out_small.shape == (8, output_dims)
    assert jnp.allclose(out_small, ref_small, **TOL)

    # Case 2: larger "edge batch" exercising the tiled/pipelined path
    # (grid of several row tiles + row padding + output lane padding/slice).
    x_big = jax.random.normal(kx2, (600, input_dims), dtype=jnp.float32)
    out_big = jax.block_until_ready(
        my_edge_conv_forward(x_big, w1, b1, w2, b2, row_tile=256))
    ref_big = reference_forward(x_big, w1, b1, w2, b2)
    assert out_big.shape == (600, output_dims)
    assert jnp.allclose(out_big, ref_big, **TOL)

    print("KERNEL_OK")
</pallas_src>

<mosaic_0001>
module attributes {stable_mosaic.version = 11 : i64} {
  func.func @_mlp_kernel(%arg0: i32, %arg1: memref<8x32xf32, #tpu.memory_space<vmem>>, %arg2: memref<32x128xbf16, #tpu.memory_space<vmem>>, %arg3: memref<1x128xf32, #tpu.memory_space<vmem>>, %arg4: memref<128x128xbf16, #tpu.memory_space<vmem>>, %arg5: memref<1x128xf32, #tpu.memory_space<vmem>>, %arg6: memref<8x128xf32, #tpu.memory_space<vmem>>) attributes {dimension_semantics = [#tpu.dimension_semantics<parallel>], iteration_bounds = array<i64: 1>, scalar_prefetch = 0 : i64, scratch_operands = 0 : i64, tpu.core_type = #tpu.core_type<tc>, window_params = [{transform_indices = @transform_0, window_bounds = array<i64: 8, 32>}, {pipeline_mode = #tpu.pipeline_mode<synchronous>, transform_indices = @transform_1, window_bounds = array<i64: 32, 128>}, {pipeline_mode = #tpu.pipeline_mode<synchronous>, transform_indices = @transform_2, window_bounds = array<i64: 1, 128>}, {pipeline_mode = #tpu.pipeline_mode<synchronous>, transform_indices = @transform_3, window_bounds = array<i64: 128, 128>}, {pipeline_mode = #tpu.pipeline_mode<synchronous>, transform_indices = @transform_4, window_bounds = array<i64: 1, 128>}, {transform_indices = @transform_5, window_bounds = array<i64: 8, 128>}]} {
    %c0 = arith.constant 0 : index
    %c0_0 = arith.constant 0 : index
    %0 = vector.load %arg1[%c0, %c0_0] : memref<8x32xf32, #tpu.memory_space<vmem>>, vector<8x32xf32>
    %1 = arith.truncf %0 : vector<8x32xf32> to vector<8x32xbf16>
    %c0_1 = arith.constant 0 : index
    %c0_2 = arith.constant 0 : index
    %2 = vector.load %arg2[%c0_1, %c0_2] : memref<32x128xbf16, #tpu.memory_space<vmem>>, vector<32x128xbf16>
    %cst = arith.constant dense<0.000000e+00> : vector<8x128xf32>
    %3 = tpu.matmul %1, %2, %cst {dimension_numbers = #tpu.dot_dimension_numbers<[1], [0], [0], [1], [0, 0, 1, 1], [], []>} : vector<8x32xbf16>, vector<32x128xbf16>, vector<8x128xf32> -> vector<8x128xf32>
    %c0_3 = arith.constant 0 : index
    %c0_4 = arith.constant 0 : index
    %4 = vector.load %arg3[%c0_3, %c0_4] : memref<1x128xf32, #tpu.memory_space<vmem>>, vector<1x128xf32>
    %5 = vector.broadcast %4 : vector<1x128xf32> to vector<8x128xf32>
    %6 = arith.addf %3, %5 : vector<8x128xf32>
    %cst_5 = arith.constant 0.000000e+00 : f32
    %7 = vector.broadcast %cst_5 : f32 to vector<8x128xf32>
    %8 = arith.maximumf %6, %7 : vector<8x128xf32>
    %9 = arith.truncf %8 : vector<8x128xf32> to vector<8x128xbf16>
    %c0_6 = arith.constant 0 : index
    %c0_7 = arith.constant 0 : index
    %10 = vector.load %arg4[%c0_6, %c0_7] : memref<128x128xbf16, #tpu.memory_space<vmem>>, vector<128x128xbf16>
    %cst_8 = arith.constant dense<0.000000e+00> : vector<8x128xf32>
    %11 = tpu.matmul %9, %10, %cst_8 {dimension_numbers = #tpu.dot_dimension_numbers<[1], [0], [0], [1], [0, 0, 1, 1], [], []>} : vector<8x128xbf16>, vector<128x128xbf16>, vector<8x128xf32> -> vector<8x128xf32>
    %c0_9 = arith.constant 0 : index
    %c0_10 = arith.constant 0 : index
    %12 = vector.load %arg5[%c0_9, %c0_10] : memref<1x128xf32, #tpu.memory_space<vmem>>, vector<1x128xf32>
    %13 = vector.broadcast %12 : vector<1x128xf32> to vector<8x128xf32>
    %14 = arith.addf %11, %13 : vector<8x128xf32>
    %c0_11 = arith.constant 0 : index
    %c0_12 = arith.constant 0 : index
    %15 = vector.load %arg6[%c0_11, %c0_12] : memref<8x128xf32, #tpu.memory_space<vmem>>, vector<8x128xf32>
    tpu.vector_store %arg6[%c0_11, %c0_12], %14 {strides = array<i32>} : memref<8x128xf32, #tpu.memory_space<vmem>>, vector<8x128xf32>,
    return
  }
  func.func @transform_0(%arg0: i32) -> (i32, i32) {
    %c0_i32 = arith.constant 0 : i32
    %c0_i32_0 = arith.constant 0 : i32
    return %arg0, %c0_i32 : i32, i32
  }
  func.func @transform_1(%arg0: i32) -> (i32, i32) {
    %c0_i32 = arith.constant 0 : i32
    %c0_i32_0 = arith.constant 0 : i32
    %c0_i32_1 = arith.constant 0 : i32
    return %c0_i32, %c0_i32_0 : i32, i32
  }
  func.func @transform_2(%arg0: i32) -> (i32, i32) {
    %c0_i32 = arith.constant 0 : i32
    %c0_i32_0 = arith.constant 0 : i32
    %c0_i32_1 = arith.constant 0 : i32
    return %c0_i32, %c0_i32_0 : i32, i32
  }
  func.func @transform_3(%arg0: i32) -> (i32, i32) {
    %c0_i32 = arith.constant 0 : i32
    %c0_i32_0 = arith.constant 0 : i32
    %c0_i32_1 = arith.constant 0 : i32
    return %c0_i32, %c0_i32_0 : i32, i32
  }
  func.func @transform_4(%arg0: i32) -> (i32, i32) {
    %c0_i32 = arith.constant 0 : i32
    %c0_i32_0 = arith.constant 0 : i32
    %c0_i32_1 = arith.constant 0 : i32
    return %c0_i32, %c0_i32_0 : i32, i32
  }
  func.func @transform_5(%arg0: i32) -> (i32, i32) {
    %c0_i32 = arith.constant 0 : i32
    %c0_i32_0 = arith.constant 0 : i32
    return %arg0, %c0_i32 : i32, i32
  }
}

</mosaic_0001>

<bundles_post_ra>
// kernel: my_edge_conv_forward.1
= control target key start
LH: loop header
LB: loop body
LE: loop exit
PB: predicated region body
PF: predicated region fallthrough
CT: control target
= control target key end

     0   :  { %v307_v1 = vmov 0.0   ;;  %vm308_vm0 = vmmov 0   ;;  %vm47_vm1 = vcmask 261120   ;;  %s382_s0 = inlined_call_operand.vmem [shape: f32[8,32], index: 0, kind: input, shape index: {}]   ;;  %s383_s1 = inlined_call_operand.vmem [shape: bf16[32,128], index: 1, kind: input, shape index: {}]   ;;  %s384_s2 = inlined_call_operand.vmem [shape: f32[1,128], index: 2, kind: input, shape index: {}]   ;;  %s385_s3 = inlined_call_operand.vmem [shape: bf16[128,128], index: 3, kind: input, shape index: {}]   ;;  %s386_s4 = inlined_call_operand.vmem [shape: f32[1,128], index: 4, kind: input, shape index: {}]   ;;  %s387_s5 = inlined_call_operand.hbm [shape: f32[8,128], index: 5, kind: output, shape index: {}]  }
   0x1   :  { %v275_v0 = vld [vmem:[%s383_s1 + $0x8] sm:$0xff]   ;;  %244 = vmatprep.subr.bf16.mxu0 %v307_v1  ;;  %v276_v2 = vld [vmem:[%s383_s1] sm:$0xff]   ;;  %252 = vmatprep.subr.bf16.mxu1 %v307_v1  ;;  %v277_v4 = vld [vmem:[%s385_s3 + $0x38] sm:$0xff]  }
   0x2   :  { %245 = vmatpush3.bf16.msra.mxu0 %v275_v0  ;;  %248 = vmatprep.mubr.msk.bf16.mxu0 %vm308_vm0, %v307_v1  ;;  %v22_v3 = vld [vmem:[%s382_s0] sm:$0xff]  ;;  %v278_v6 = vld [vmem:[%s385_s3 + $0x30] sm:$0xff]   ;;  %v279_v7 = vld [vmem:[%s385_s3 + $0x28] sm:$0xff]  }
   0x3   :  { %246 = vmatprep.subr.bf16.mxu0 %v307_v1  ;;  %268 = vmatprep.mubr.msk.bf16.mxu1 %vm308_vm0, %v307_v1  ;;  %v23_v5 = vpack.c.bf16 %v22_v3, %v22_v3 }
   0x4   :  { %253 = vmatpush3.bf16.msra.mxu1 %v277_v4 }
   0x5   :  { %254 = vmatprep.subr.bf16.mxu1 %v307_v1 }
   0x6   :  { %247 = vmatpush3.bf16.msra.mxu0 %v276_v2 }
   0x8   :  { %255 = vmatpush3.bf16.msra.mxu1 %v278_v6 }
   0x9   :  { %249 = vmatmul.mubr.msk.bf16.vlgmr.msra.gmra.mxu0 %vm47_vm1, %v23_v5  ;;  %256 = vmatprep.subr.bf16.mxu1 %v307_v1 }
   0xa   :  { %10 = vsyncpa [#allocation3], 0  ;;  %v280_v8 = vld [vmem:[%s385_s3 + $0x20] sm:$0xff]   ;;  %v281_v9 = vld [vmem:[%s385_s3 + $0x18] sm:$0xff]   ;;  %s309_s17 = smov [#allocation2]  }
   0xb   :  { %v282_v10 = vld [vmem:[%s385_s3 + $0x10] sm:$0xff]   ;;  %v283_v11 = vld [vmem:[%s385_s3 + $0x8] sm:$0xff]   ;;  %v284_v12 = vld [vmem:[%s385_s3] sm:$0xff]   ;;  %s211_s18 = sshll.u32 %s309_s17, 4  ;;  %s212_s18 = int_to_ptr.vmem [resolvable:$true] %s211_s18 }
   0xc   :  { %257 = vmatpush3.bf16.msra.mxu1 %v279_v7  ;;  %v219_v13 = vld [vmem:[%s384_s2] ss:$0 sm:$0xff]  ;;  %s285_s2 = scalar_lea.vmem %s212_s18, 128  ;;  %p290_p1 = scmp.lt.s32.totalorder %s212_s18, %s212_s18 }
   0xd   :  { %258 = vmatprep.subr.bf16.mxu1 %v307_v1  ;;  %v223_v21 = vld [vmem:[%s386_s4] ss:$0 sm:$0xff]  ;;  %p286_p0 = scmp.ne.s32.totalorder %s212_s18, %s285_s2  ;;  %p291_p2 = scmp.lt.s32.totalorder %s285_s2, %s285_s2 }
   0xf   :  { %p292_p3 = por %p291_p2, %p290_p1 }
  0x10   :  { %259 = vmatpush3.bf16.msra.mxu1 %v280_v8 }
  0x11   :  { %260 = vmatprep.subr.bf16.mxu1 %v307_v1  ;;  %p293_p4 = pnand %p292_p3, %p286_p0 }
  0x14   :  { %261 = vmatpush3.bf16.msra.mxu1 %v281_v9 }
  0x15   :  { %262 = vmatprep.subr.bf16.mxu1 %v307_v1 }
  0x18   :  { %263 = vmatpush3.bf16.msra.mxu1 %v282_v10 }
  0x19   :  { %264 = vmatprep.subr.bf16.mxu1 %v307_v1 }
  0x1c   :  { %265 = vmatpush3.bf16.msra.mxu1 %v283_v11 }
  0x1d   :  { %266 = vmatprep.subr.bf16.mxu1 %v307_v1 }
  0x20   :  { %267 = vmatpush3.bf16.msra.mxu1 %v284_v12 }
  0xc9   :  { %v85_v14 = vpop.f32.mrf.mxu0 }
  0xca   :  { %v86_v15 = vadd.f32 %v219_v13, %v85_v14 }
  0xcb   :  { %v250_v16 = vpop.f32.mrf.mxu0 }
  0xcc   :  { %v91_v17 = vmax.f32 %v86_v15, 0.0 }
  0xcd   :  { %v88_v18 = vpop.f32.mrf.mxu0 }
  0xce   :  { %v92_v19 = vpack.c.bf16 %v91_v17, %v91_v17 }
  0xcf   :  { %v251_v20 = vpop.f32.mrf.mxu0 }
  0xd0   :  { %269 = vmatmul.mubr.bf16.vlgmr.msra.gmra.mxu1 %v92_v19 }
 0x190   :  { %v198_v22 = vpop.f32.mrf.mxu1 }
 0x191   :  { %v199_v23 = vadd.f32 %v223_v21, %v198_v22 }
 0x192   :  { %v270_v24 = vpop.f32.mrf.mxu1 }
 0x193   :  { %204 = vst [vmem:[#allocation2] sm:$0xff] %v199_v23 }
 0x194   :  { %v201_v25 = vpop.f32.mrf.mxu1 }
 0x195   :  { %296 = shalt.err (!%p293_p4)
}
 0x196   :  { %214 = dma.vmem_to_hbm [thread:$0]  %s212_s18, 128, %s387_s5, [#allocation3]   ;;  %v271_v26 = vpop.f32.mrf.mxu1 }
 0x197   :  { %305 = dma.done.wait [#allocation3], 128  }
 0x198   :  { %306 = vsyncadd [#allocation3], 4294967168 }
 0x199   :  { %218 = vsyncpa [#allocation3], 1 }

</bundles_post_ra>
